<compile_context>
chip_gen: v5e
topology: v5e:2x2
jax: 0.10.0
libtpu: 0.0.40
codegen_flags: <defaults>
</compile_context>

<pallas_src>
import jax
import jax.numpy as jnp
from jax.experimental import pallas as pl
from jax.experimental.pallas import tpu as pltpu


def _init_embed_kernel(x_ref, w_ref, b_ref, o_ref):
    # x_ref: (TM, F) node features, w_ref: (F, H), b_ref: (1, H), o_ref: (TM, H)
    x = x_ref[...].astype(jnp.float32)
    w = w_ref[...].astype(jnp.float32)
    # K = F (tiny, e.g. 2) matmul on the otherwise-idle MXU; accumulate in f32.
    acc = jnp.dot(x, w, preferred_element_type=jnp.float32)
    o_ref[...] = (acc + b_ref[...].astype(jnp.float32)).astype(o_ref.dtype)


def _choose_tm(M, F, H, x_itemsize, out_itemsize, tm_req):
    """Pick an M-tile size: big enough to amortize per-step pipeline overhead,
    small enough to fit the most conservative scoped-VMEM default (v5e 16 MiB),
    and capped so the grid has >= 2 steps for v7x megacore sharding."""
    # Per-row VMEM bytes (lanes pad to 128 in VMEM), double-buffered in + out.
    x_row = 128 * pl.cdiv(F, 128) * x_itemsize
    o_row = 128 * pl.cdiv(H, 128) * out_itemsize
    per_row = 2 * (x_row + o_row)
    budget = 10 * 1024 * 1024
    cap = max(16, budget // max(per_row, 1))
    cap = (cap // 256) * 256 if cap >= 256 else (cap // 16) * 16
    tm = min(tm_req, max(16, cap))
    # >= 2 grid steps when there is enough work so both v7x TensorCores run.
    if M >= 64:
        tm = min(tm, 32 * pl.cdiv(pl.cdiv(M, 2), 32))
    # Never exceed the (rounded-up) problem size; keep a multiple of 16 so the
    # tile is sublane-aligned for both f32 and bf16 outputs.
    tm = min(tm, 16 * pl.cdiv(M, 16))
    return max(16, tm)


def symnco_init_embed(x, w, b, *, tm=8192, out_dtype=jnp.bfloat16):
    """x: (B, N, F), w: (F, H), b: (H,) or (1, H) -> (B, N, H) = x @ w + b.

    Compute is f32; only the final store is cast to `out_dtype` (bf16 by
    default, matching the downstream SymNCO encoder dtype and halving the
    dominant HBM writeback).  Pass out_dtype=jnp.float32 for exact reference
    semantics.
    """
    B, N, F = x.shape
    H = w.shape[1]
    out_dtype = jnp.dtype(out_dtype)

    M = B * N
    x_flat = x.reshape(M, F)
    b2d = b.reshape(1, H)

    tm = _choose_tm(M, F, H, x_flat.dtype.itemsize, out_dtype.itemsize, tm)
    grid = (pl.cdiv(M, tm),)  # ragged last block: padded reads, masked writes

    cost = pl.CostEstimate(
        flops=2 * M * F * H,
        transcendentals=0,
        bytes_accessed=(
            M * F * x_flat.dtype.itemsize
            + F * H * w.dtype.itemsize
            + H * b.dtype.itemsize
            + M * H * out_dtype.itemsize
        ),
    )

    out_flat = pl.pallas_call(
        _init_embed_kernel,
        out_shape=jax.ShapeDtypeStruct((M, H), out_dtype),
        grid_spec=pltpu.PrefetchScalarGridSpec(
            num_scalar_prefetch=0,
            grid=grid,
            in_specs=[
                pl.BlockSpec((tm, F), lambda i: (i, 0)),   # streamed M tiles
                pl.BlockSpec((F, H), lambda i: (0, 0)),    # VMEM-resident weight
                pl.BlockSpec((1, H), lambda i: (0, 0)),    # VMEM-resident bias
            ],
            out_specs=pl.BlockSpec((tm, H), lambda i: (i, 0)),
        ),
        compiler_params=pltpu.CompilerParams(
            dimension_semantics=("parallel",),  # megacore sharding on v7x
        ),
        cost_estimate=cost,
    )(x_flat, w, b2d)

    return out_flat.reshape(B, N, H)


class SymNCOInitEmbedderPallas:
    """JAX/Pallas port of SymNCOInitEmbedder.

    The torch base class has no parameters and an abstract forward; here we
    provide the standard concrete behaviour (Linear(node_dim -> hidden_dim)
    over node features) with deterministically initialized weights.
    """

    # TODO(synk): the torch base class forward() raises NotImplementedError;
    # the canonical Linear init-embedding is implemented here as the forward.

    def __init__(self, hidden_dim: int, node_dim: int = 2, key=None):
        self.hidden_dim = hidden_dim
        self.node_dim = node_dim
        if key is None:
            key = jax.random.PRNGKey(42)
        kw, kb = jax.random.split(key)
        # nn.Linear-style uniform init: U(-1/sqrt(fan_in), 1/sqrt(fan_in))
        bound = 1.0 / (node_dim ** 0.5)
        self.w = jax.random.uniform(
            kw, (node_dim, hidden_dim), jnp.float32, minval=-bound, maxval=bound
        )
        self.b = jax.random.uniform(
            kb, (hidden_dim,), jnp.float32, minval=-bound, maxval=bound
        )
        # Hoisted out of the per-call path (static parameter).
        self.b2d = self.b.reshape(1, hidden_dim)

    def __call__(self, locs, out_dtype=jnp.bfloat16):
        # locs: (B, N, node_dim) node coordinates/features
        return symnco_init_embed(locs, self.w, self.b2d, out_dtype=out_dtype)


if __name__ == "__main__":
    key = jax.random.PRNGKey(0)

    # Small shapes consistent with the module: batch=2, nodes=8, node_dim=2,
    # hidden=32 (H is NOT padded; the kernel writes (M, H) directly).
    B, N, F, H = 2, 8, 2, 32
    locs = jax.random.uniform(key, (B, N, F), jnp.float32)

    embedder = SymNCOInitEmbedderPallas(hidden_dim=H, node_dim=F)

    ref = (locs.reshape(B * N, F) @ embedder.w + embedder.b).reshape(B, N, H)

    # Exact-semantics path (f32 output).
    out_f32 = jax.block_until_ready(embedder(locs, out_dtype=jnp.float32))
    assert out_f32.shape == (B, N, H)
    assert out_f32.dtype == jnp.float32
    assert jnp.allclose(out_f32, ref, atol=1e-5, rtol=1e-5)

    # Default fast path (bf16 writeback, f32 compute).
    out_bf16 = jax.block_until_ready(embedder(locs))
    assert out_bf16.shape == (B, N, H)
    assert out_bf16.dtype == jnp.bfloat16
    assert jnp.allclose(out_bf16.astype(jnp.float32), ref, atol=2e-2, rtol=2e-2)

    # Second check exercising the multi-step grid + ragged tail block
    # (M = 1500 is not a multiple of the tile size; Pallas masks tail writes).
    B2, N2 = 3, 500
    locs2 = jax.random.uniform(jax.random.PRNGKey(1), (B2, N2, F), jnp.float32)
    out2 = jax.block_until_ready(embedder(locs2, out_dtype=jnp.float32))
    ref2 = (locs2.reshape(B2 * N2, F) @ embedder.w + embedder.b).reshape(B2, N2, H)
    assert out2.shape == (B2, N2, H)
    assert jnp.allclose(out2, ref2, atol=1e-5, rtol=1e-5)

    print("KERNEL_OK")
</pallas_src>

<mosaic_0001>
module attributes {stable_mosaic.version = 11 : i64} {
  func.func @_init_embed_kernel(%arg0: i32, %arg1: memref<16x2xf32, #tpu.memory_space<vmem>>, %arg2: memref<2x32xf32, #tpu.memory_space<vmem>>, %arg3: memref<1x32xf32, #tpu.memory_space<vmem>>, %arg4: memref<16x32xf32, #tpu.memory_space<vmem>>) attributes {dimension_semantics = [#tpu.dimension_semantics<parallel>], iteration_bounds = array<i64: 1>, scalar_prefetch = 0 : i64, scratch_operands = 0 : i64, tpu.core_type = #tpu.core_type<tc>, window_params = [{transform_indices = @transform_0, window_bounds = array<i64: 16, 2>}, {pipeline_mode = #tpu.pipeline_mode<synchronous>, transform_indices = @transform_1, window_bounds = array<i64: 2, 32>}, {pipeline_mode = #tpu.pipeline_mode<synchronous>, transform_indices = @transform_2, window_bounds = array<i64: 1, 32>}, {transform_indices = @transform_3, window_bounds = array<i64: 16, 32>}]} {
    %c0 = arith.constant 0 : index
    %c0_0 = arith.constant 0 : index
    %0 = vector.load %arg1[%c0, %c0_0] : memref<16x2xf32, #tpu.memory_space<vmem>>, vector<16x2xf32>
    %c0_1 = arith.constant 0 : index
    %c0_2 = arith.constant 0 : index
    %1 = vector.load %arg2[%c0_1, %c0_2] : memref<2x32xf32, #tpu.memory_space<vmem>>, vector<2x32xf32>
    %cst = arith.constant dense<0.000000e+00> : vector<16x32xf32>
    %2 = tpu.matmul %0, %1, %cst {dimension_numbers = #tpu.dot_dimension_numbers<[1], [0], [0], [1], [0, 0, 1, 1], [], []>} : vector<16x2xf32>, vector<2x32xf32>, vector<16x32xf32> -> vector<16x32xf32>
    %c0_3 = arith.constant 0 : index
    %c0_4 = arith.constant 0 : index
    %3 = vector.load %arg3[%c0_3, %c0_4] : memref<1x32xf32, #tpu.memory_space<vmem>>, vector<1x32xf32>
    %4 = vector.broadcast %3 : vector<1x32xf32> to vector<16x32xf32>
    %5 = arith.addf %2, %4 : vector<16x32xf32>
    %c0_5 = arith.constant 0 : index
    %c0_6 = arith.constant 0 : index
    %6 = vector.load %arg4[%c0_5, %c0_6] : memref<16x32xf32, #tpu.memory_space<vmem>>, vector<16x32xf32>
    tpu.vector_store %arg4[%c0_5, %c0_6], %5 {strides = array<i32>} : memref<16x32xf32, #tpu.memory_space<vmem>>, vector<16x32xf32>,
    return
  }
  func.func @transform_0(%arg0: i32) -> (i32, i32) {
    %c0_i32 = arith.constant 0 : i32
    %c0_i32_0 = arith.constant 0 : i32
    return %arg0, %c0_i32 : i32, i32
  }
  func.func @transform_1(%arg0: i32) -> (i32, i32) {
    %c0_i32 = arith.constant 0 : i32
    %c0_i32_0 = arith.constant 0 : i32
    %c0_i32_1 = arith.constant 0 : i32
    return %c0_i32, %c0_i32_0 : i32, i32
  }
  func.func @transform_2(%arg0: i32) -> (i32, i32) {
    %c0_i32 = arith.constant 0 : i32
    %c0_i32_0 = arith.constant 0 : i32
    %c0_i32_1 = arith.constant 0 : i32
    return %c0_i32, %c0_i32_0 : i32, i32
  }
  func.func @transform_3(%arg0: i32) -> (i32, i32) {
    %c0_i32 = arith.constant 0 : i32
    %c0_i32_0 = arith.constant 0 : i32
    return %arg0, %c0_i32 : i32, i32
  }
}

</mosaic_0001>

<bundles_post_ra>
// kernel: tpu_custom_call.1
= control target key start
LH: loop header
LB: loop body
LE: loop exit
PB: predicated region body
PF: predicated region fallthrough
CT: control target
= control target key end

     0   :  { %vm29_vm0 = vcmask 1041408   ;;  %vm22_vm1 = vcmask 15360   ;;  %s149_s0 = inlined_call_operand.vmem [shape: f32[16,2], index: 0, kind: input, shape index: {}]   ;;  %s150_s1 = inlined_call_operand.vmem [shape: f32[2,32], index: 1, kind: input, shape index: {}]   ;;  %s151_s2 = inlined_call_operand.vmem [shape: f32[1,32], index: 2, kind: input, shape index: {}]   ;;  %s152_s3 = inlined_call_operand.hbm [shape: f32[16,32], index: 3, kind: output, shape index: {}]  }
   0x1   :  { %v17_v0 = vld [vmem:[%s150_s1] sm:$0x3]  ;;  %v16_v2 = vld [vmem:[%s149_s0 + $0x8] sm:$0xff] }
   0x2   :  { %v15_v1 = vld [vmem:[%s149_s0] sm:$0xff]  ;;  %77 = vmatpush.msk.msra.mxu0 %vm29_vm0, %v17_v0  ;;  %80 = vmatpush.msk.msra.mxu1 %vm29_vm0, %v17_v0 }
   0x3   :  { %8 = vsyncpa [#allocation3], 0  ;;  %78 = vmatmul.msk.f32.vlgmr.msra.gmra.mxu0 %vm22_vm1, %v15_v1  ;;  %79 = vmatmul.msk.f32.vlgmr.msra.gmra.mxu1 %vm22_vm1, %v16_v2  ;;  %v84_v3 = vld [vmem:[%s151_s2] ss:$0 sm:$0xff]  ;;  %s111_s1 = smov [#allocation2]   ;;  %s65_s23 = sshll.u32 %s152_s3, 4  ;;  %s66_s23 = int_to_ptr.hbm [resolvable:$true] %s65_s23 }
   0x4   :  { %s63_s20 = sshll.u32 %s111_s1, 4  ;;  %vm56_vm2 = vcmask 261120   ;;  %s112_s0 = smov 128   ;;  %s64_s20 = int_to_ptr.vmem [resolvable:$true] %s63_s20 }
   0x5   :  { %s113_s24 = smov 8  }
  0x80   :  { %v50_v4 = vpop.f32.mrf.mxu0  ;;  %v53_v5 = vpop.f32.mrf.mxu1 }
  0x81   :  { %v51_v6 = vadd.f32 %v84_v3, %v50_v4  ;;  %v54_v7 = vadd.f32 %v84_v3, %v53_v5 }
  0x83   :  { %57 = vst.msk [vmem:[#allocation2] sm:$0xff] %vm56_vm2, %v51_v6 }
  0x84   :  { %58 = vst.msk [vmem:[#allocation2 + $0x8] sm:$0xff] %vm56_vm2, %v54_v7 }
  0x85   :  { %71 = dma.vmem_to_hbm [thread:$0]  %s64_s20, 256, %s66_s23, [#allocation3], %s112_s0, %s112_s0, %s113_s24  }
  0x86   :  { %109 = dma.done.wait [#allocation3], 256  }
  0x87   :  { %110 = vsyncadd [#allocation3], 4294967040 }
  0x88   :  { %76 = vsyncpa [#allocation3], 1 }

</bundles_post_ra>
